<compile_context>
chip_gen: v6e
topology: v6e:2x2x1
jax: 0.10.0
libtpu: 0.0.40
codegen_flags: <defaults>
</compile_context>

<pallas_src>
import jax
import jax.numpy as jnp
from jax.experimental import pallas as pl
from jax.experimental.pallas import tpu as pltpu


def fused_kernel(x_ref, p_ref, o_ref):
    # x_ref: SMEM (Cin*S,) -- x flattened in native (B=1, Cin, S) order, x[c*S + s]
    # p_ref: VMEM (Cin+1, Cout) -- rows 0..Cin-1 = W^T rows, row Cin = bias
    # o_ref: VMEM (1, S, Cout)
    cin = p_ref.shape[0] - 1
    s_len = o_ref.shape[1]

    bias_row = p_ref[cin:cin + 1, :]                          # (1, Cout)
    for s in range(s_len):                                    # static unroll (S == 2)
        acc = bias_row
        for c in range(cin):                                  # static unroll (Cin == 2)
            # SMEM scalar * VMEM row: cheap scalar->vector broadcast FMA on the VPU.
            acc = acc + x_ref[c * s_len + s] * p_ref[c:c + 1, :]
        # v3/v4: AvgPool2d(kernel=1, stride=1, pad=0) is the identity.
        # v5/v6: with B == 1, S > 1, Cout > 1, torch .squeeze() drops only the
        # batch dim, so v6 = v2 + v2[0] == 2 * v2 exactly.
        o_ref[0, s:s + 1, :] = (acc + acc).astype(o_ref.dtype)


def pack_params(weight, bias):
    """One-time parameter prep (call OUTSIDE the jitted step).

    Packs the Linear parameters into a single (Cin+1, Cout) operand:
    rows 0..Cin-1 are W^T, the last row is the bias.  One operand -> one DMA.
    """
    return jnp.concatenate([weight.T, bias[None, :]], axis=0)


def model_forward(x1, packed_params):
    # x1: (B, Cin, S) in native PyTorch layout -- the permute(0, 2, 1) is fused
    # into the kernel (no wrapper-side transpose of activations).
    B, Cin, S = x1.shape
    Cout = packed_params.shape[1]
    assert packed_params.shape[0] == Cin + 1
    # TODO(synk): torch .squeeze() removes ALL size-1 dims; the 2*v2 collapse
    # used in the kernel requires exactly these shape conditions.
    assert B == 1 and S > 1 and Cout > 1, "squeeze() collapse needs B==1, S>1, Cout>1"

    return pl.pallas_call(
        fused_kernel,
        out_shape=jax.ShapeDtypeStruct((B, S, Cout), x1.dtype),
        in_specs=[
            pl.BlockSpec(memory_space=pltpu.MemorySpace.SMEM),   # flat x (scalars)
            pl.BlockSpec(memory_space=pltpu.MemorySpace.VMEM),   # packed [W^T; b]
        ],
        out_specs=pl.BlockSpec(memory_space=pltpu.MemorySpace.VMEM),
        # Advisory: the whole problem is ~56 bytes / ~16 flops, so tell XLA the
        # custom call is tiny and should be scheduled as cheap.
        cost_estimate=pl.CostEstimate(flops=16, bytes_accessed=56,
                                      transcendentals=0),
    )(x1.reshape(-1), packed_params)


if __name__ == "__main__":
    key = jax.random.PRNGKey(0)
    kx, kw, kb = jax.random.split(key, 3)

    # Shapes implied by the module: x1 = (1, 2, 2), Linear(2, 2).
    B, Cin, S = 1, 2, 2
    in_features, out_features = 2, 2

    x1 = jax.random.normal(kx, (B, Cin, S), dtype=jnp.float32)

    # Deterministic nn.Linear-style init: U(-1/sqrt(in), 1/sqrt(in)).
    bound = 1.0 / (in_features ** 0.5)
    weight = jax.random.uniform(kw, (out_features, in_features),
                                dtype=jnp.float32, minval=-bound, maxval=bound)
    bias = jax.random.uniform(kb, (out_features,),
                              dtype=jnp.float32, minval=-bound, maxval=bound)

    packed = pack_params(weight, bias)       # pre-packed once, outside the jit
    fwd = jax.jit(model_forward)
    out = fwd(x1, packed)
    jax.block_until_ready(out)

    # Pure-JAX reference with the original module's semantics.
    v1 = jnp.transpose(x1, (0, 2, 1))
    v2 = v1 @ weight.T + bias                # F.linear
    ref = v2 + v2[0]                         # AvgPool2d(1x1)=identity; squeeze (B==1)
    assert jnp.allclose(out, ref, atol=1e-5, rtol=1e-5), "mismatch vs reference"

    print("KERNEL_OK")
</pallas_src>

<mosaic_0001>
module attributes {stable_mosaic.version = 11 : i64} {
  func.func @fused_kernel(%arg0: memref<4xf32, #tpu.memory_space<smem>>, %arg1: memref<3x2xf32, #tpu.memory_space<vmem>>, %arg2: memref<1x2x2xf32, #tpu.memory_space<vmem>>) attributes {dimension_semantics = [], scalar_prefetch = 0 : i64, scratch_operands = 0 : i64, tpu.core_type = #tpu.core_type<tc>} {
    %c2 = arith.constant 2 : index
    %c0 = arith.constant 0 : index
    %0 = vector.load %arg1[%c2, %c0] : memref<3x2xf32, #tpu.memory_space<vmem>>, vector<1x2xf32>
    %c0_0 = arith.constant 0 : index
    %1 = memref.load %arg0[%c0_0] : memref<4xf32, #tpu.memory_space<smem>>
    %c0_1 = arith.constant 0 : index
    %c0_2 = arith.constant 0 : index
    %2 = vector.load %arg1[%c0_1, %c0_2] : memref<3x2xf32, #tpu.memory_space<vmem>>, vector<1x2xf32>
    %3 = vector.broadcast %1 : f32 to vector<1x2xf32>
    %4 = arith.mulf %3, %2 : vector<1x2xf32>
    %5 = arith.addf %0, %4 : vector<1x2xf32>
    %c2_3 = arith.constant 2 : index
    %6 = memref.load %arg0[%c2_3] : memref<4xf32, #tpu.memory_space<smem>>
    %c1 = arith.constant 1 : index
    %c0_4 = arith.constant 0 : index
    %7 = vector.load %arg1[%c1, %c0_4] : memref<3x2xf32, #tpu.memory_space<vmem>>, vector<1x2xf32>
    %8 = vector.broadcast %6 : f32 to vector<1x2xf32>
    %9 = arith.mulf %8, %7 : vector<1x2xf32>
    %10 = arith.addf %5, %9 : vector<1x2xf32>
    %11 = arith.addf %10, %10 : vector<1x2xf32>
    %c0_5 = arith.constant 0 : index
    %c0_6 = arith.constant 0 : index
    %c0_7 = arith.constant 0 : index
    %12 = vector.load %arg2[%c0_5, %c0_6, %c0_7] : memref<1x2x2xf32, #tpu.memory_space<vmem>>, vector<1x1x2xf32>
    %13 = vector.shape_cast %12 : vector<1x1x2xf32> to vector<1x2xf32>
    %14 = vector.shape_cast %11 : vector<1x2xf32> to vector<1x1x2xf32>
    tpu.vector_store %arg2[%c0_5, %c0_6, %c0_7], %14 {strides = array<i32>} : memref<1x2x2xf32, #tpu.memory_space<vmem>>, vector<1x1x2xf32>,
    %c1_8 = arith.constant 1 : index
    %15 = memref.load %arg0[%c1_8] : memref<4xf32, #tpu.memory_space<smem>>
    %c0_9 = arith.constant 0 : index
    %c0_10 = arith.constant 0 : index
    %16 = vector.load %arg1[%c0_9, %c0_10] : memref<3x2xf32, #tpu.memory_space<vmem>>, vector<1x2xf32>
    %17 = vector.broadcast %15 : f32 to vector<1x2xf32>
    %18 = arith.mulf %17, %16 : vector<1x2xf32>
    %19 = arith.addf %0, %18 : vector<1x2xf32>
    %c3 = arith.constant 3 : index
    %20 = memref.load %arg0[%c3] : memref<4xf32, #tpu.memory_space<smem>>
    %c1_11 = arith.constant 1 : index
    %c0_12 = arith.constant 0 : index
    %21 = vector.load %arg1[%c1_11, %c0_12] : memref<3x2xf32, #tpu.memory_space<vmem>>, vector<1x2xf32>
    %22 = vector.broadcast %20 : f32 to vector<1x2xf32>
    %23 = arith.mulf %22, %21 : vector<1x2xf32>
    %24 = arith.addf %19, %23 : vector<1x2xf32>
    %25 = arith.addf %24, %24 : vector<1x2xf32>
    %c0_13 = arith.constant 0 : index
    %c1_14 = arith.constant 1 : index
    %c0_15 = arith.constant 0 : index
    %26 = vector.load %arg2[%c0_13, %c1_14, %c0_15] : memref<1x2x2xf32, #tpu.memory_space<vmem>>, vector<1x1x2xf32>
    %27 = vector.shape_cast %26 : vector<1x1x2xf32> to vector<1x2xf32>
    %28 = vector.shape_cast %25 : vector<1x2xf32> to vector<1x1x2xf32>
    tpu.vector_store %arg2[%c0_13, %c1_14, %c0_15], %28 {strides = array<i32>} : memref<1x2x2xf32, #tpu.memory_space<vmem>>, vector<1x1x2xf32>,
    return
  }
}

</mosaic_0001>

<bundles_post_ra>
// kernel: model_forward.1
= control target key start
LH: loop header
LB: loop body
LE: loop exit
PB: predicated region body
PF: predicated region fallthrough
CT: control target
= control target key end

     0   :  { %7 = vsyncpa [#allocation4], 0  ;;  %s145_s0 = inlined_call_operand.vmem [shape: f32[4], index: 0, kind: input, shape index: {}]   ;;  %s146_s1 = inlined_call_operand.vmem [shape: f32[3,2], index: 1, kind: input, shape index: {}]   ;;  %s147_s2 = inlined_call_operand.hbm [shape: f32[1,2,2], index: 2, kind: output, shape index: {}]  }
   0x1   :  { %8 = vsyncpa [#allocation3], 0  ;;  %s15_s11 = sshll.u32 %s145_s0, 4  ;;  %s16_s11 = int_to_ptr.vmem [resolvable:$true] %s15_s11 }
   0x2   :  { %s71_s12 = scalar_lea.vmem %s16_s11, 16  ;;  %p76_p1 = scmp.lt.s32.totalorder %s16_s11, %s16_s11 }
   0x3   :  { %p72_p0 = scmp.ne.s32.totalorder %s16_s11, %s71_s12  ;;  %p77_p2 = scmp.lt.s32.totalorder %s71_s12, %s71_s12 }
   0x5   :  { %p78_p3 = por %p77_p2, %p76_p1 }
   0x7   :  { %p79_p4 = pnand %p78_p3, %p72_p0 }
   0x9   :  { %82 = shalt.err (!%p79_p4)
}
   0xa   :  { %s107_s13 = smov [#allocation2]  }
   0xb   :  { %18 = dma.vmem_to_smem %s16_s11, 16, %s107_s13, [#allocation4]  }
   0xc   :  { %103 = dma.done.wait [#allocation4], 16  }
   0xd   :  { %104 = vsyncadd [#allocation4], 4294967280 }
   0xe   :  { %24 = sfence }
   0xf   :  { %s26_s14 = sld [smem:[#allocation2]]  ;;  %v27_v0 = vld [vmem:[%s146_s1] sm:$0x1]  ;;  %v32_v1 = vld [vmem:[%s146_s1 + $0x1] sm:$0x1]  ;;  %vm37_vm0 = vcmask 8192  }
  0x10   :  { %s66_s15 = sld [smem:[#allocation2 + $0x2]]  ;;  %v25_v2 = vld [vmem:[%s146_s1 + $0x2] sm:$0x1]  ;;  %v40_v4 = vld [vmem:[%s146_s1] sm:$0x1]  ;;  %s108_s27 = smov [#allocation5]  }
  0x11   :  { %s67_s16 = sld [smem:[#allocation2 + $0x1]]  ;;  %v45_v7 = vld [vmem:[%s146_s1 + $0x1] sm:$0x1]  ;;  %s57_s28 = sshll.u32 %s108_s27, 4  ;;  %s58_s28 = int_to_ptr.vmem [resolvable:$true] %s57_s28 }
  0x12   :  { %s68_s17 = sld [smem:[#allocation2 + $0x3]]  ;;  %s83_s29 = scalar_lea.vmem %s58_s28, 32 }
  0x13   :  { %p84_p5 = scmp.ne.s32.totalorder %s58_s28, %s83_s29  ;;  %p88_p6 = scmp.lt.s32.totalorder %s58_s28, %s58_s28 }
  0x14   :  { %p89_p7 = scmp.lt.s32.totalorder %s83_s29, %s83_s29 }
  0x15   :  { %v28_v3 = vstv %s26_s14 }
  0x16   :  { %v29_v5 = vmul.f32 %v28_v3, %v27_v0  ;;  %v33_v6 = vstv %s66_s15  ;;  %p90_p8 = por %p89_p7, %p88_p6 }
  0x17   :  { %v34_v8 = vmul.f32 %v33_v6, %v32_v1  ;;  %v41_v9 = vstv %s67_s16 }
  0x18   :  { %v30_v10 = vadd.f32 %v29_v5, %v25_v2  ;;  %v42_v11 = vmul.f32 %v41_v9, %v40_v4  ;;  %v46_v12 = vstv %s68_s17  ;;  %p91_p9 = pnand %p90_p8, %p84_p5 }
  0x19   :  { %v47_v13 = vmul.f32 %v46_v12, %v45_v7 }
  0x1a   :  { %v35_v14 = vadd.f32 %v34_v8, %v30_v10  ;;  %v43_v15 = vadd.f32 %v42_v11, %v25_v2 }
  0x1c   :  { %v36_v16 = vadd.f32 %v35_v14, %v35_v14  ;;  %v48_v17 = vadd.f32 %v47_v13, %v43_v15 }
  0x1e   :  { %38 = vst.msk [vmem:[#allocation5] sm:$0x1] %vm37_vm0, %v36_v16  ;;  %v49_v18 = vadd.f32 %v48_v17, %v48_v17 }
  0x20   :  { %50 = vst.msk [vmem:[#allocation5 + $0x1] sm:$0x1] %vm37_vm0, %v49_v18 }
  0x21   :  { %94 = shalt.err (!%p91_p9)
}
  0x22   :  { %60 = dma.vmem_to_hbm [thread:$0]  %s58_s28, 32, %s147_s2, [#allocation3]  }
  0x23   :  { %105 = dma.done.wait [#allocation3], 32  }
  0x24   :  { %106 = vsyncadd [#allocation3], 4294967264 }
  0x25   :  { %64 = vsyncpa [#allocation3], 1 }
  0x26   :  { %65 = vsyncpa [#allocation4], 1 }

</bundles_post_ra>
